<compile_context>
chip_gen: v5e
topology: v5e:2x2
jax: 0.10.0
libtpu: 0.0.40
codegen_flags: <defaults>
</compile_context>

<pallas_src>
import jax
import jax.numpy as jnp
from jax import lax
from jax.experimental import pallas as pl
from jax.experimental.pallas import tpu as pltpu

LANE = 128


def _round_up(n, m):
    return ((n + m - 1) // m) * m


def _pick_b_tile(B):
    """Batch tile: fill MXU height (128/256) and prefer >=2 tiles (v7x 2 TCs)."""
    if B % 256 == 0 and B >= 512:
        return 256
    if B % 128 == 0 and B >= 256:
        return 128
    if B % 256 == 0:
        return 256
    if B % 128 == 0:
        return 128
    if B > 128:
        return 128
    return _round_up(B, 8)


def _vmem_limit(needed_bytes):
    return int(min(max(int(needed_bytes * 1.25), 32 * 1024 * 1024),
                   128 * 1024 * 1024))


def _pad_h(h, Hp):
    H = h.shape[1]
    return h if Hp == H else jnp.pad(h, ((0, 0), (0, Hp - H)))


# ----------------------------------------------------------------------------
# Kernel bodies
# ----------------------------------------------------------------------------
def _gates_from_xp(xp, h, hz, hp):
    """Gate math on f32 tiles. xp already contains x@Wx + b (all three gates)."""
    z = jax.nn.sigmoid(xp[:, 0:hp] + hz[:, 0:hp])            # update gate
    r = jax.nn.sigmoid(xp[:, hp:2 * hp] + hz[:, hp:2 * hp])  # reset gate
    g = jnp.tanh(xp[:, 2 * hp:] + r * hz[:, 2 * hp:])        # new gate
    return g + z * (h - g)


def project_kernel(x_ref, wx_ref, b_ref, out_ref):
    """xp = x @ Wx_cat + b_cat as one wide MXU matmul (bias folded in here)."""
    x = x_ref[...].astype(wx_ref.dtype)
    out_ref[...] = (jnp.dot(x, wx_ref[...], preferred_element_type=jnp.float32)
                    + b_ref[...]).astype(out_ref.dtype)


def gru_cell_kernel(x_ref, h_ref, wx_ref, wh_ref, b_ref, out_ref):
    """Single GRU step on one batch tile: 2 fused matmuls + gates + blend."""
    hp = out_ref.shape[1]
    h = h_ref[...]
    xp = jnp.dot(x_ref[...].astype(wx_ref.dtype), wx_ref[...],
                 preferred_element_type=jnp.float32) + b_ref[...]
    hz = jnp.dot(h.astype(wh_ref.dtype), wh_ref[...],
                 preferred_element_type=jnp.float32)
    out_ref[...] = _gates_from_xp(xp, h, hz, hp).astype(out_ref.dtype)


def gru_seq_stream_kernel(xp_ref, h0_ref, wh_ref, out_ref, h_scr):
    """Recurrence over the (inner) T grid axis; h carried in VMEM scratch."""
    t = pl.program_id(1)

    @pl.when(t == 0)
    def _():
        h_scr[...] = h0_ref[...]

    hp = h_scr.shape[1]
    h = h_scr[...]
    hz = jnp.dot(h.astype(wh_ref.dtype), wh_ref[...],
                 preferred_element_type=jnp.float32)
    h_new = _gates_from_xp(xp_ref[0], h, hz, hp)
    h_scr[...] = h_new
    out_ref[0] = h_new.astype(out_ref.dtype)


def gru_seq_fused_kernel(xp_ref, h0_ref, wh_ref, out_ref, h_scr):
    """Whole time loop inside the kernel: xp/out VMEM-resident per batch tile,
    removes per-grid-step overhead for small problems."""
    hp = h_scr.shape[1]
    n_t = xp_ref.shape[0]
    h_scr[...] = h0_ref[...]

    def step(t, carry):
        h = h_scr[...]
        hz = jnp.dot(h.astype(wh_ref.dtype), wh_ref[...],
                     preferred_element_type=jnp.float32)
        h_new = _gates_from_xp(xp_ref[t], h, hz, hp)
        h_scr[...] = h_new
        out_ref[t] = h_new.astype(out_ref.dtype)
        return carry

    lax.fori_loop(0, n_t, step, 0, unroll=True)


# ----------------------------------------------------------------------------
# Parameter init / packing
# ----------------------------------------------------------------------------
def init_params(key, input_size, hidden_size):
    """Matches uniform_(-std, std) with std = 1/sqrt(H); Linear W stored as W^T."""
    std = 1.0 / (hidden_size ** 0.5)
    keys = jax.random.split(key, 9)
    u = lambda k, shape: jax.random.uniform(
        k, shape, dtype=jnp.float32, minval=-std, maxval=std)
    wxz = u(keys[0], (input_size, hidden_size))
    wxr = u(keys[1], (input_size, hidden_size))
    wxg = u(keys[2], (input_size, hidden_size))
    bz = u(keys[3], (1, hidden_size))
    br = u(keys[4], (1, hidden_size))
    bg = u(keys[5], (1, hidden_size))
    whz = u(keys[6], (hidden_size, hidden_size))
    whr = u(keys[7], (hidden_size, hidden_size))
    whg = u(keys[8], (hidden_size, hidden_size))
    return (wxz, wxr, wxg, bz, br, bg, whz, whr, whg)


def pack_params(params, input_size, hidden_size, weight_dtype=jnp.float32):
    """Concatenate per-gate weights along a lane-padded output axis.

    Columns [0:Hp)=z, [Hp:2Hp)=r, [2Hp:3Hp)=g with zero padding to
    Hp = round_up(H, 128). Wh rows beyond H are zero so a zero-padded h
    contributes nothing; padded gate columns provably stay zero. Weights may
    be bf16 (MXU native); the bias stays f32 and is folded into xp.
    """
    wxz, wxr, wxg, bz, br, bg, whz, whr, whg = params
    H = hidden_size
    Hp = _round_up(H, LANE)
    wx = jnp.zeros((input_size, 3 * Hp), jnp.float32)
    wh = jnp.zeros((Hp, 3 * Hp), jnp.float32)
    b = jnp.zeros((1, 3 * Hp), jnp.float32)
    for i, (w_x, w_h, b_x) in enumerate(
            ((wxz, whz, bz), (wxr, whr, br), (wxg, whg, bg))):
        c0 = i * Hp
        wx = wx.at[:, c0:c0 + H].set(w_x)
        wh = wh.at[:H, c0:c0 + H].set(w_h)
        b = b.at[:, c0:c0 + H].set(b_x)
    return wx.astype(weight_dtype), wh.astype(weight_dtype), b, Hp


# ----------------------------------------------------------------------------
# Wrappers
# ----------------------------------------------------------------------------
def project_x(x2d, wx, b, row_tile=None):
    """One big (N, IN) x (IN, 3Hp) matmul + bias over all rows (no recurrence)."""
    N, IN = x2d.shape
    c3 = wx.shape[1]
    if row_tile is None:
        row_tile = min(512, _round_up(N, 8))
    Np = _round_up(N, row_tile)
    if Np != N:
        x2d = jnp.pad(x2d, ((0, Np - N), (0, 0)))

    wbytes = wx.size * wx.dtype.itemsize + b.size * 4
    flops = 2 * Np * IN * c3
    bytes_acc = Np * IN * 4 + wbytes + Np * c3 * 4

    out = pl.pallas_call(
        project_kernel,
        out_shape=jax.ShapeDtypeStruct((Np, c3), jnp.float32),
        grid=(Np // row_tile,),
        in_specs=[
            pl.BlockSpec((row_tile, IN), lambda i: (i, 0)),
            pl.BlockSpec(wx.shape, lambda i: (0, 0)),     # resident
            pl.BlockSpec(b.shape, lambda i: (0, 0)),      # resident
        ],
        out_specs=pl.BlockSpec((row_tile, c3), lambda i: (i, 0)),
        compiler_params=pltpu.CompilerParams(
            dimension_semantics=("parallel",),
            vmem_limit_bytes=_vmem_limit(
                wbytes + 2 * row_tile * (IN + c3) * 4)),
        cost_estimate=pl.CostEstimate(flops=int(flops), transcendentals=0,
                                      bytes_accessed=int(bytes_acc)),
    )(x2d, wx, b)
    return out[:N]


def gru_cell(x, h, packed, b_tile=None):
    """Single GRUCell step (matches the PyTorch module forward)."""
    wx, wh, b, Hp = packed
    B, IN = x.shape
    H = h.shape[1]
    if b_tile is None:
        b_tile = _pick_b_tile(B)
    Bp = _round_up(B, b_tile)

    x_in = jnp.pad(x, ((0, Bp - B), (0, 0))) if Bp != B else x
    h_in = _pad_h(h, Hp)
    if Bp != B:
        h_in = jnp.pad(h_in, ((0, Bp - B), (0, 0)))

    wbytes = (wx.size * wx.dtype.itemsize + wh.size * wh.dtype.itemsize
              + b.size * 4)
    flops = 2 * Bp * (IN + Hp) * 3 * Hp + 10 * Bp * Hp
    bytes_acc = (x_in.size + h_in.size) * 4 + wbytes + Bp * Hp * 4

    out = pl.pallas_call(
        gru_cell_kernel,
        out_shape=jax.ShapeDtypeStruct((Bp, Hp), jnp.float32),
        grid=(Bp // b_tile,),
        in_specs=[
            pl.BlockSpec((b_tile, IN), lambda i: (i, 0)),
            pl.BlockSpec((b_tile, Hp), lambda i: (i, 0)),
            pl.BlockSpec(wx.shape, lambda i: (0, 0)),     # resident
            pl.BlockSpec(wh.shape, lambda i: (0, 0)),     # resident
            pl.BlockSpec(b.shape, lambda i: (0, 0)),      # resident
        ],
        out_specs=pl.BlockSpec((b_tile, Hp), lambda i: (i, 0)),
        compiler_params=pltpu.CompilerParams(
            dimension_semantics=("parallel",),
            vmem_limit_bytes=_vmem_limit(
                wbytes + 2 * b_tile * (IN + 2 * Hp) * 4)),
        cost_estimate=pl.CostEstimate(
            flops=int(flops), transcendentals=int(3 * Bp * Hp),
            bytes_accessed=int(bytes_acc)),
    )(x_in, h_in, wx, wh, b)
    return out[:B, :H]


def gru_sequence(xs, h0, packed, b_tile=None, stream_time=None):
    """Full recurrence in one pallas_call. x-projection hoisted to one big
    matmul; Wh VMEM-resident; h carried in VMEM scratch; batch tiles parallel.
    stream_time=None auto-selects between the in-kernel time loop (small
    problems) and the streamed (batch, T) grid (large problems)."""
    wx, wh, b, Hp = packed
    T, B, IN = xs.shape
    H = h0.shape[1]
    if b_tile is None:
        b_tile = _pick_b_tile(B)
    Bp = _round_up(B, b_tile)

    # (1) Hoisted input projection: no sequential dependence -> one big matmul.
    xp = project_x(xs.reshape(T * B, IN), wx, b).reshape(T, B, 3 * Hp)

    h_in = _pad_h(h0, Hp)
    if Bp != B:
        xp = jnp.pad(xp, ((0, 0), (0, Bp - B), (0, 0)))
        h_in = jnp.pad(h_in, ((0, Bp - B), (0, 0)))

    wh_bytes = wh.size * wh.dtype.itemsize
    resident_per_tile = T * b_tile * (4 * Hp) * 4          # xp(3Hp)+out(Hp), f32
    if stream_time is None:
        stream_time = resident_per_tile > (4 << 20)

    flops = T * (2 * Bp * Hp * 3 * Hp + 10 * Bp * Hp)
    trans = T * 3 * Bp * Hp
    bytes_acc = (xp.size * xp.dtype.itemsize + h_in.size * 4 + wh_bytes
                 + T * Bp * Hp * 4)
    scratch = [pltpu.VMEM((b_tile, Hp), jnp.float32)]

    if stream_time:
        grid = (Bp // b_tile, T)                           # T innermost, serial
        kernel = gru_seq_stream_kernel
        in_specs = [
            pl.BlockSpec((1, b_tile, 3 * Hp), lambda bi, t: (t, bi, 0)),  # xp_t
            pl.BlockSpec((b_tile, Hp), lambda bi, t: (bi, 0)),            # h0
            pl.BlockSpec(wh.shape, lambda bi, t: (0, 0)),                 # Wh
        ]
        out_specs = pl.BlockSpec((1, b_tile, Hp), lambda bi, t: (t, bi, 0))
        semantics = ("parallel", "arbitrary")
        needed = (2 * wh_bytes + 4 * b_tile * (4 * Hp) * 4
                  + 3 * b_tile * Hp * 4)
    else:
        grid = (Bp // b_tile,)
        kernel = gru_seq_fused_kernel
        in_specs = [
            pl.BlockSpec((T, b_tile, 3 * Hp), lambda bi: (0, bi, 0)),     # xp
            pl.BlockSpec((b_tile, Hp), lambda bi: (bi, 0)),               # h0
            pl.BlockSpec(wh.shape, lambda bi: (0, 0)),                    # Wh
        ]
        out_specs = pl.BlockSpec((T, b_tile, Hp), lambda bi: (0, bi, 0))
        semantics = ("parallel",)
        needed = 2 * wh_bytes + 2 * resident_per_tile + 3 * b_tile * Hp * 4

    out = pl.pallas_call(
        kernel,
        out_shape=jax.ShapeDtypeStruct((T, Bp, Hp), jnp.float32),
        grid=grid,
        in_specs=in_specs,
        out_specs=out_specs,
        scratch_shapes=scratch,
        compiler_params=pltpu.CompilerParams(
            dimension_semantics=semantics,
            vmem_limit_bytes=_vmem_limit(needed)),
        cost_estimate=pl.CostEstimate(
            flops=int(flops), transcendentals=int(trans),
            bytes_accessed=int(bytes_acc)),
    )(xp, h_in, wh)
    return out[:, :B, :H]


# ----------------------------------------------------------------------------
# Plain-JAX references
# ----------------------------------------------------------------------------
def gru_cell_ref(x, h, params):
    wxz, wxr, wxg, bz, br, bg, whz, whr, whg = params
    z = jax.nn.sigmoid(x @ wxz + bz + h @ whz)
    r = jax.nn.sigmoid(x @ wxr + br + h @ whr)
    g = jnp.tanh(x @ wxg + bg + r * (h @ whg))
    return g + z * (h - g)


def gru_sequence_ref(xs, h0, params):
    h = h0
    outs = []
    for t in range(xs.shape[0]):
        h = gru_cell_ref(xs[t], h, params)
        outs.append(h)
    return jnp.stack(outs, 0)


if __name__ == "__main__":
    B, INPUT_SIZE, HIDDEN_SIZE, T = 8, 16, 32, 8

    key = jax.random.PRNGKey(0)
    kx, kh, kp, ks = jax.random.split(key, 4)
    x = jax.random.normal(kx, (B, INPUT_SIZE), dtype=jnp.float32)
    h = jax.random.normal(kh, (B, HIDDEN_SIZE), dtype=jnp.float32)
    xs = jax.random.normal(ks, (T, B, INPUT_SIZE), dtype=jnp.float32)

    params = init_params(kp, INPUT_SIZE, HIDDEN_SIZE)
    packed_f32 = pack_params(params, INPUT_SIZE, HIDDEN_SIZE, jnp.float32)
    packed_bf16 = pack_params(params, INPUT_SIZE, HIDDEN_SIZE, jnp.bfloat16)

    # Single-step cell (the module's forward), f32 weights: tight tolerance.
    out = jax.block_until_ready(gru_cell(x, h, packed_f32))
    ref = gru_cell_ref(x, h, params)
    assert out.shape == (B, HIDDEN_SIZE)
    assert jnp.allclose(out, ref, atol=1e-5, rtol=1e-5)

    # Single-step cell with bf16 (MXU-native) weights: loose tolerance.
    out_bf = jax.block_until_ready(gru_cell(x, h, packed_bf16))
    assert float(jnp.max(jnp.abs(out_bf - ref))) < 7.5e-2

    # Full recurrence, small-problem path (in-kernel fori_loop over T).
    seq_ref = gru_sequence_ref(xs, h, params)
    seq_fused = jax.block_until_ready(
        gru_sequence(xs, h, packed_f32, stream_time=False))
    assert seq_fused.shape == (T, B, HIDDEN_SIZE)
    assert jnp.allclose(seq_fused, seq_ref, atol=1e-4, rtol=1e-4)

    # Full recurrence, large-problem path (streamed (batch, T) grid).
    seq_stream = jax.block_until_ready(
        gru_sequence(xs, h, packed_f32, stream_time=True))
    assert jnp.allclose(seq_stream, seq_ref, atol=1e-4, rtol=1e-4)

    # Full recurrence with bf16 weights (auto path): loose tolerance.
    seq_bf = jax.block_until_ready(gru_sequence(xs, h, packed_bf16))
    assert float(jnp.max(jnp.abs(seq_bf - seq_ref))) < 2e-1

    print("KERNEL_OK")
</pallas_src>

<mosaic_0001>
module attributes {stable_mosaic.version = 11 : i64} {
  func.func @gru_cell_kernel(%arg0: i32, %arg1: memref<8x16xf32, #tpu.memory_space<vmem>>, %arg2: memref<8x128xf32, #tpu.memory_space<vmem>>, %arg3: memref<16x384xf32, #tpu.memory_space<vmem>>, %arg4: memref<128x384xf32, #tpu.memory_space<vmem>>, %arg5: memref<1x384xf32, #tpu.memory_space<vmem>>, %arg6: memref<8x128xf32, #tpu.memory_space<vmem>>) attributes {dimension_semantics = [#tpu.dimension_semantics<parallel>], iteration_bounds = array<i64: 1>, scalar_prefetch = 0 : i64, scratch_operands = 0 : i64, tpu.core_type = #tpu.core_type<tc>, window_params = [{transform_indices = @transform_0, window_bounds = array<i64: 8, 16>}, {transform_indices = @transform_1, window_bounds = array<i64: 8, 128>}, {pipeline_mode = #tpu.pipeline_mode<synchronous>, transform_indices = @transform_2, window_bounds = array<i64: 16, 384>}, {pipeline_mode = #tpu.pipeline_mode<synchronous>, transform_indices = @transform_3, window_bounds = array<i64: 128, 384>}, {pipeline_mode = #tpu.pipeline_mode<synchronous>, transform_indices = @transform_4, window_bounds = array<i64: 1, 384>}, {transform_indices = @transform_5, window_bounds = array<i64: 8, 128>}]} {
    %c0 = arith.constant 0 : index
    %c0_0 = arith.constant 0 : index
    %0 = vector.load %arg2[%c0, %c0_0] : memref<8x128xf32, #tpu.memory_space<vmem>>, vector<8x128xf32>
    %c0_1 = arith.constant 0 : index
    %c0_2 = arith.constant 0 : index
    %1 = vector.load %arg1[%c0_1, %c0_2] : memref<8x16xf32, #tpu.memory_space<vmem>>, vector<8x16xf32>
    %c0_3 = arith.constant 0 : index
    %c0_4 = arith.constant 0 : index
    %2 = vector.load %arg3[%c0_3, %c0_4] : memref<16x384xf32, #tpu.memory_space<vmem>>, vector<16x384xf32>
    %cst = arith.constant dense<0.000000e+00> : vector<8x384xf32>
    %3 = tpu.matmul %1, %2, %cst {dimension_numbers = #tpu.dot_dimension_numbers<[1], [0], [0], [1], [0, 0, 1, 1], [], []>} : vector<8x16xf32>, vector<16x384xf32>, vector<8x384xf32> -> vector<8x384xf32>
    %c0_5 = arith.constant 0 : index
    %c0_6 = arith.constant 0 : index
    %4 = vector.load %arg5[%c0_5, %c0_6] : memref<1x384xf32, #tpu.memory_space<vmem>>, vector<1x384xf32>
    %5 = vector.broadcast %4 : vector<1x384xf32> to vector<8x384xf32>
    %6 = arith.addf %3, %5 : vector<8x384xf32>
    %c0_7 = arith.constant 0 : index
    %c0_8 = arith.constant 0 : index
    %7 = vector.load %arg4[%c0_7, %c0_8] : memref<128x384xf32, #tpu.memory_space<vmem>>, vector<128x384xf32>
    %cst_9 = arith.constant dense<0.000000e+00> : vector<8x384xf32>
    %8 = tpu.matmul %0, %7, %cst_9 {dimension_numbers = #tpu.dot_dimension_numbers<[1], [0], [0], [1], [0, 0, 1, 1], [], []>} : vector<8x128xf32>, vector<128x384xf32>, vector<8x384xf32> -> vector<8x384xf32>
    %9 = vector.extract_strided_slice %6 {offsets = [0, 0], sizes = [8, 128], strides = [1, 1]} : vector<8x384xf32> to vector<8x128xf32>
    %10 = vector.extract_strided_slice %8 {offsets = [0, 0], sizes = [8, 128], strides = [1, 1]} : vector<8x384xf32> to vector<8x128xf32>
    %11 = arith.addf %9, %10 : vector<8x128xf32>
    %12 = arith.negf %11 : vector<8x128xf32>
    %13 = math.exp %12 : vector<8x128xf32>
    %cst_10 = arith.constant 1.000000e+00 : f32
    %14 = vector.broadcast %cst_10 : f32 to vector<8x128xf32>
    %15 = arith.addf %14, %13 : vector<8x128xf32>
    %16 = arith.divf %14, %15 : vector<8x128xf32>
    %17 = vector.extract_strided_slice %6 {offsets = [0, 128], sizes = [8, 128], strides = [1, 1]} : vector<8x384xf32> to vector<8x128xf32>
    %18 = vector.extract_strided_slice %8 {offsets = [0, 128], sizes = [8, 128], strides = [1, 1]} : vector<8x384xf32> to vector<8x128xf32>
    %19 = arith.addf %17, %18 : vector<8x128xf32>
    %20 = arith.negf %19 : vector<8x128xf32>
    %21 = math.exp %20 : vector<8x128xf32>
    %cst_11 = arith.constant 1.000000e+00 : f32
    %22 = vector.broadcast %cst_11 : f32 to vector<8x128xf32>
    %23 = arith.addf %22, %21 : vector<8x128xf32>
    %24 = arith.divf %22, %23 : vector<8x128xf32>
    %25 = vector.extract_strided_slice %6 {offsets = [0, 256], sizes = [8, 128], strides = [1, 1]} : vector<8x384xf32> to vector<8x128xf32>
    %26 = vector.extract_strided_slice %8 {offsets = [0, 256], sizes = [8, 128], strides = [1, 1]} : vector<8x384xf32> to vector<8x128xf32>
    %27 = arith.mulf %24, %26 : vector<8x128xf32>
    %28 = arith.addf %25, %27 : vector<8x128xf32>
    %29 = math.tanh %28 : vector<8x128xf32>
    %30 = arith.subf %0, %29 : vector<8x128xf32>
    %31 = arith.mulf %16, %30 : vector<8x128xf32>
    %32 = arith.addf %29, %31 : vector<8x128xf32>
    %c0_12 = arith.constant 0 : index
    %c0_13 = arith.constant 0 : index
    %33 = vector.load %arg6[%c0_12, %c0_13] : memref<8x128xf32, #tpu.memory_space<vmem>>, vector<8x128xf32>
    tpu.vector_store %arg6[%c0_12, %c0_13], %32 {strides = array<i32>} : memref<8x128xf32, #tpu.memory_space<vmem>>, vector<8x128xf32>,
    return
  }
  func.func @transform_0(%arg0: i32) -> (i32, i32) {
    %c0_i32 = arith.constant 0 : i32
    %c0_i32_0 = arith.constant 0 : i32
    return %arg0, %c0_i32 : i32, i32
  }
  func.func @transform_1(%arg0: i32) -> (i32, i32) {
    %c0_i32 = arith.constant 0 : i32
    %c0_i32_0 = arith.constant 0 : i32
    return %arg0, %c0_i32 : i32, i32
  }
  func.func @transform_2(%arg0: i32) -> (i32, i32) {
    %c0_i32 = arith.constant 0 : i32
    %c0_i32_0 = arith.constant 0 : i32
    %c0_i32_1 = arith.constant 0 : i32
    return %c0_i32, %c0_i32_0 : i32, i32
  }
  func.func @transform_3(%arg0: i32) -> (i32, i32) {
    %c0_i32 = arith.constant 0 : i32
    %c0_i32_0 = arith.constant 0 : i32
    %c0_i32_1 = arith.constant 0 : i32
    return %c0_i32, %c0_i32_0 : i32, i32
  }
  func.func @transform_4(%arg0: i32) -> (i32, i32) {
    %c0_i32 = arith.constant 0 : i32
    %c0_i32_0 = arith.constant 0 : i32
    %c0_i32_1 = arith.constant 0 : i32
    return %c0_i32, %c0_i32_0 : i32, i32
  }
  func.func @transform_5(%arg0: i32) -> (i32, i32) {
    %c0_i32 = arith.constant 0 : i32
    %c0_i32_0 = arith.constant 0 : i32
    return %arg0, %c0_i32 : i32, i32
  }
}

</mosaic_0001>

<bundles_post_ra>
// kernel: tpu_custom_call.1
= control target key start
LH: loop header
LB: loop body
LE: loop exit
PB: predicated region body
PF: predicated region fallthrough
CT: control target
= control target key end

     0   :  { %10 = vsyncpa [#allocation3], 0  ;;  %s553_s0 = inlined_call_operand.hbm [shape: f32[8,16], index: 0, kind: input, shape index: {}]   ;;  %s554_s1 = inlined_call_operand.hbm [shape: f32[8,128], index: 1, kind: input, shape index: {}]   ;;  %s555_s2 = inlined_call_operand.hbm [shape: f32[16,384], index: 2, kind: input, shape index: {}]   ;;  %s556_s3 = inlined_call_operand.hbm [shape: f32[128,384], index: 3, kind: input, shape index: {}]   ;;  %s557_s4 = inlined_call_operand.vmem [shape: f32[1,384], index: 4, kind: input, shape index: {}]   ;;  %s558_s5 = inlined_call_operand.hbm [shape: f32[8,128], index: 5, kind: output, shape index: {}]  }
   0x1   :  { %11 = vsyncpa [#allocation6], 0 }
   0x2   :  { %12 = vsyncpa [#allocation9], 0  ;;  %s30_s20 = sshll.u32 %s554_s1, 4  ;;  %s31_s20 = int_to_ptr.hbm [resolvable:$true] %s30_s20 }
   0x3   :  { %13 = vsyncpa [#allocation4], 0  ;;  %s484_s21 = smov [#allocation5]   ;;  %s19_s25 = sshll.u32 %s553_s0, 4  ;;  %s20_s25 = int_to_ptr.hbm [resolvable:$true] %s19_s25 }
   0x4   :  { %s32_s22 = sshll.u32 %s484_s21, 4  ;;  %s485_s26 = smov [#allocation2]   ;;  %s33_s22 = int_to_ptr.vmem [resolvable:$true] %s32_s22 }
   0x5   :  { %35 = dma.hbm_to_vmem [thread:$0]  %s31_s20, 128, %s33_s22, [#allocation6]  }
   0x6   :  { %s21_s27 = sshll.u32 %s485_s26, 4  ;;  %s40_s30 = sshll.u32 %s555_s2, 4  ;;  %s22_s27 = int_to_ptr.vmem [resolvable:$true] %s21_s27  ;;  %s41_s30 = int_to_ptr.hbm [resolvable:$true] %s40_s30 }
   0x7   :  { %24 = dma.hbm_to_vmem [thread:$0]  %s20_s25, 128, %s22_s27, [#allocation3]  }
   0x8   :  { %s486_s1 = smov [#allocation7]   ;;  %s53_s9 = sshll.u32 %s556_s3, 4  ;;  %s54_s9 = int_to_ptr.hbm [resolvable:$true] %s53_s9 }
   0x9   :  { %s42_s6 = sshll.u32 %s486_s1, 4  ;;  %s487_s10 = smov 384   ;;  %s43_s6 = int_to_ptr.vmem [resolvable:$true] %s42_s6 }
   0xa   :  { %s488_s0 = smov 24   ;;  %s489_s11 = smov [#allocation8]  }
   0xb   :  { %48 = dma.hbm_to_vmem [thread:$0]  %s41_s30, 768, %s43_s6, [#allocation6], %s487_s10, %s487_s10, %s488_s0  }
   0xc   :  { %s55_s12 = sshll.u32 %s489_s11, 4  ;;  %s56_s12 = int_to_ptr.vmem [resolvable:$true] %s55_s12 }
   0xd   :  { %61 = dma.hbm_to_vmem [thread:$0]  %s54_s9, 6144, %s56_s12, [#allocation9], %s487_s10, %s487_s10, %s488_s0  }
   0xe   :  { %476 = dma.done.wait [#allocation3], 128  }
   0xf   :  { %477 = vsyncadd [#allocation3], 4294967168 }
  0x10   :  { %478 = dma.done.wait [#allocation6], 896  }
  0x11   :  { %479 = vsyncadd [#allocation6], 4294966400 }
  0x12   :  { %480 = dma.done.wait [#allocation9], 6144  }
  0x13   :  { %481 = vsyncadd [#allocation9], 4294961152  ;;  %v205_v0 = vld [vmem:[#allocation8 + $0x168] sm:$0xff]  ;;  %v206_v1 = vld [vmem:[#allocation8 + $0x170] sm:$0xff]  ;;  %vm96_vm0 = vcmask 130048   ;;  %s322_s16 = sshll.u32 %s558_s5, 4  ;;  %s323_s16 = int_to_ptr.hbm [resolvable:$true] %s322_s16 }
  0x14   :  { %v202_v2 = vld [vmem:[#allocation8 + $0x150] sm:$0xff]  ;;  %208 = vmatpush.msra.mxu3 %v205_v0  ;;  %228 = vmatpush.msra.mxu0 %v206_v1  ;;  %v203_v3 = vld [vmem:[#allocation8 + $0x158] sm:$0xff]  ;;  %v200_v5 = vld [vmem:[#allocation8 + $0x140] sm:$0xff] }
  0x15   :  { %v199_v4 = vld [vmem:[#allocation8 + $0x138] sm:$0xff]  ;;  %v196_v6 = vld [vmem:[#allocation8 + $0x120] sm:$0xff]  ;;  %v197_v7 = vld [vmem:[#allocation8 + $0x128] sm:$0xff] }
  0x16   :  { %209 = vmatpush.msra.mxu3 %v202_v2  ;;  %229 = vmatpush.msra.mxu0 %v203_v3  ;;  %v85_v8 = vld [vmem:[#allocation7 + $0x18] sm:$0xff]  ;;  %v82_v9 = vld [vmem:[#allocation7] sm:$0xff]  ;;  %v533_v12 = vld [vmem:[#allocation2] sm:$0xff] }
  0x17   :  { %v193_v10 = vld [vmem:[#allocation8 + $0x108] sm:$0xff]  ;;  %v194_v11 = vld [vmem:[#allocation8 + $0x110] sm:$0xff]  ;;  %114 = vmatpush.msra.mxu2 %v85_v8  ;;  %v191_v14 = vld [vmem:[#allocation8 + $0xf8] sm:$0xff] }
  0x18   :  { %210 = vmatpush.msra.mxu3 %v199_v4  ;;  %230 = vmatpush.msra.mxu0 %v200_v5  ;;  %v190_v13 = vld [vmem:[#allocation8 + $0xf0] sm:$0xff]  ;;  %v187_v16 = vld [vmem:[#allocation8 + $0xd8] sm:$0xff]  ;;  %v188_v17 = vld [vmem:[#allocation8 + $0xe0] sm:$0xff] }
  0x19   :  { %115 = vmatpush.msra.mxu2 %v82_v9  ;;  %v86_v15 = vld [vmem:[#allocation7 + $0x20] sm:$0xff]  ;;  %v83_v18 = vld [vmem:[#allocation7 + $0x8] sm:$0xff]  ;;  %v184_v19 = vld [vmem:[#allocation8 + $0xc0] sm:$0xff] }
  0x1a   :  { %211 = vmatpush.msra.mxu3 %v196_v6  ;;  %231 = vmatpush.msra.mxu0 %v197_v7  ;;  %v185_v20 = vld [vmem:[#allocation8 + $0xc8] sm:$0xff]  ;;  %v207_v21 = vld [vmem:[#allocation8 + $0x178] sm:$0xff]  ;;  %v204_v22 = vld [vmem:[#allocation8 + $0x160] sm:$0xff] }
  0x1b   :  { %334 = vmatmul.msk.f32.vlgmr.msra.gmra.mxu2 %vm96_vm0, %v533_v12  ;;  %v181_v23 = vld [vmem:[#allocation8 + $0xa8] sm:$0xff]  ;;  %v182_v24 = vld [vmem:[#allocation8 + $0xb0] sm:$0xff]  ;;  %248 = vmatpush.msra.mxu1 %v207_v21  ;;  %v87_v26 = vld [vmem:[#allocation7 + $0x28] sm:$0xff] }
  0x1c   :  { %212 = vmatpush.msra.mxu3 %v193_v10  ;;  %232 = vmatpush.msra.mxu0 %v194_v11  ;;  %v201_v25 = vld [vmem:[#allocation8 + $0x148] sm:$0xff]  ;;  %v178_v27 = vld [vmem:[#allocation8 + $0x90] sm:$0xff]  ;;  %v179_v28 = vld [vmem:[#allocation8 + $0x98] sm:$0xff] }
  0x1d   :  { %134 = vmatpush.msrb.mxu2 %v86_v15  ;;  %249 = vmatpush.msra.mxu1 %v204_v22  ;;  %v198_v29 = vld [vmem:[#allocation8 + $0x130] sm:$0xff]  ;;  %v84_v30 = vld [vmem:[#allocation7 + $0x10] sm:$0xff]  ;;  %v175_v31 = vld [vmem:[#allocation8 + $0x78] sm:$0xff] }
  0x1e   :  { %213 = vmatpush.msra.mxu3 %v190_v13  ;;  %233 = vmatpush.msra.mxu0 %v191_v14  ;;  %v176_v32 = vld [vmem:[#allocation8 + $0x80] sm:$0xff]  ;;  %v195_v33 = vld [vmem:[#allocation8 + $0x118] sm:$0xff]  ;;  %v173_v35 = vld [vmem:[#allocation8 + $0x68] sm:$0xff] }
  0x1f   :  { %135 = vmatpush.msrb.mxu2 %v83_v18  ;;  %250 = vmatpush.msra.mxu1 %v201_v25  ;;  %v172_v34 = vld [vmem:[#allocation8 + $0x60] sm:$0xff]  ;;  %v169_v37 = vld [vmem:[#allocation8 + $0x48] sm:$0xff]  ;;  %v170_v38 = vld [vmem:[#allocation8 + $0x50] sm:$0xff] }
  0x20   :  { %214 = vmatpush.msra.mxu3 %v187_v16  ;;  %234 = vmatpush.msra.mxu0 %v188_v17  ;;  %v192_v36 = vld [vmem:[#allocation8 + $0x100] sm:$0xff]  ;;  %v189_v39 = vld [vmem:[#allocation8 + $0xe8] sm:$0xff]  ;;  %v166_v40 = vld [vmem:[#allocation8 + $0x30] sm:$0xff] }
  0x21   :  { %154 = vmatpush.msra.mxu2 %v87_v26  ;;  %251 = vmatpush.msra.mxu1 %v198_v29  ;;  %v167_v41 = vld [vmem:[#allocation8 + $0x38] sm:$0xff]  ;;  %v186_v42 = vld [vmem:[#allocation8 + $0xd0] sm:$0xff]  ;;  %v164_v44 = vld [vmem:[#allocation8 + $0x20] sm:$0xff] }
  0x22   :  { %215 = vmatpush.msra.mxu3 %v184_v19  ;;  %235 = vmatpush.msra.mxu0 %v185_v20  ;;  %v163_v43 = vld [vmem:[#allocation8 + $0x18] sm:$0xff]  ;;  %v160_v46 = vld [vmem:[#allocation8] sm:$0xff]  ;;  %v161_v47 = vld [vmem:[#allocation8 + $0x8] sm:$0xff] }
  0x23   :  { %335 = vmatmul.msk.f32.vlgmr.msrb.gmra.mxu2 %vm96_vm0, %v533_v12  ;;  %252 = vmatpush.msra.mxu1 %v195_v33  ;;  %v183_v45 = vld [vmem:[#allocation8 + $0xb8] sm:$0xff]  ;;  %v541_v48 = vld [vmem:[#allocation5] sm:$0xff]  ;;  %v180_v49 = vld [vmem:[#allocation8 + $0xa0] sm:$0xff] }
  0x24   :  { %216 = vmatpush.msra.mxu3 %v181_v23  ;;  %236 = vmatpush.msra.mxu0 %v182_v24  ;;  %v177_v50 = vld [vmem:[#allocation8 + $0x88] sm:$0xff]  ;;  %v174_v51 = vld [vmem:[#allocation8 + $0x70] sm:$0xff]  ;;  %v171_v52 = vld [vmem:[#allocation8 + $0x58] sm:$0xff] }
  0x25   :  { %155 = vmatpush.msra.mxu2 %v84_v30  ;;  %253 = vmatpush.msra.mxu1 %v192_v36  ;;  %v168_v53 = vld [vmem:[#allocation8 + $0x40] sm:$0xff]  ;;  %v165_v54 = vld [vmem:[#allocation8 + $0x28] sm:$0xff]  ;;  %v162_v55 = vld [vmem:[#allocation8 + $0x10] sm:$0xff] }
  0x26   :  { %217 = vmatpush.msra.mxu3 %v178_v27  ;;  %237 = vmatpush.msra.mxu0 %v179_v28  ;;  %v88_v57 = vld [vmem:[%s557_s4] sm:$0x7]  ;;  %s490_s4 = smov [#allocation10]  }
  0x27   :  { %254 = vmatpush.msra.mxu1 %v189_v39  ;;  %v91_v58 = vperm.slane %v88_v57, 1  ;;  %v90_v62 = vperm.slane %v88_v57, 0  ;;  %v92_v13 = vperm.slane %v88_v57, 2  ;;  %s320_s13 = sshll.u32 %s490_s4, 4  ;;  %s321_s13 = int_to_ptr.vmem [resolvable:$true] %s320_s13 }
  0x28   :  { %218 = vmatpush.msra.mxu3 %v175_v31  ;;  %238 = vmatpush.msra.mxu0 %v176_v32 }
  0x29   :  { %255 = vmatpush.msra.mxu1 %v186_v42 }
  0x2a   :  { %219 = vmatpush.msra.mxu3 %v172_v34  ;;  %239 = vmatpush.msra.mxu0 %v173_v35 }
  0x2b   :  { %336 = vmatmul.msk.f32.vlgmr.msra.gmra.mxu2 %vm96_vm0, %v533_v12  ;;  %256 = vmatpush.msra.mxu1 %v183_v45 }
  0x2c   :  { %220 = vmatpush.msra.mxu3 %v169_v37  ;;  %240 = vmatpush.msra.mxu0 %v170_v38 }
  0x2d   :  { %257 = vmatpush.msra.mxu1 %v180_v49 }
  0x2e   :  { %221 = vmatpush.msra.mxu3 %v166_v40  ;;  %241 = vmatpush.msra.mxu0 %v167_v41 }
  0x2f   :  { %258 = vmatpush.msra.mxu1 %v177_v50 }
  0x30   :  { %222 = vmatpush.msra.mxu3 %v163_v43  ;;  %242 = vmatpush.msra.mxu0 %v164_v44 }
  0x31   :  { %259 = vmatpush.msra.mxu1 %v174_v51 }
  0x32   :  { %223 = vmatpush.msra.mxu3 %v160_v46  ;;  %243 = vmatpush.msra.mxu0 %v161_v47 }
  0x33   :  { %224 = vmatmul.f32.vlgmr.msra.gmra.mxu3 %v541_v48  ;;  %244 = vmatmul.f32.vlgmr.msra.gmra.mxu0 %v541_v48 }
  0x34   :  { %260 = vmatpush.msra.mxu1 %v171_v52 }
  0x36   :  { %261 = vmatpush.msra.mxu1 %v168_v53 }
  0x38   :  { %262 = vmatpush.msra.mxu1 %v165_v54 }
  0x3a   :  { %263 = vmatpush.msra.mxu1 %v162_v55 }
  0x3b   :  { %264 = vmatmul.f32.vlgmr.msra.gmra.mxu1 %v541_v48 }
  0x9e   :  { %v117_v56 = vpop.f32.mrf.mxu2 }
  0x9f   :  { %v118_v1 = vadd.f32 %v117_v56, %v90_v62 }
  0xa6   :  { %v137_v59 = vpop.f32.mrf.mxu2 }
  0xa7   :  { %v138_v60 = vadd.f32 %v137_v59, %v91_v58 }
  0xae   :  { %v157_v17 = vpop.f32.mrf.mxu2 }
  0xaf   :  { %v158_v23 = vadd.f32 %v157_v17, %v92_v13 }
  0xb0   :  { %v245_v61 = vpop.f32.mrf.mxu0 }
  0xb1   :  { %v288_v63 = vadd.f32 %v245_v61, %v138_v60 }
  0xb3   :  { %v338_v0 = vmul.f32 -1.442695, %v288_v63 }
  0xb5   :  { %346 = vpow2.f32 %v338_v0 }
  0xb6   :  { %v225_v2 = vpop.f32.mrf.mxu3 }
  0xb7   :  { %v268_v3 = vadd.f32 %v225_v2, %v118_v1 }
  0xb8   :  { %v265_v20 = vpop.f32.mrf.mxu1 }
  0xb9   :  { %v337_v4 = vmul.f32 -1.442695, %v268_v3 }
  0xbb   :  { %v347_v5 = vpop.eup %346  ;;  %348 = vpow2.f32 %v337_v4 }
  0xbc   :  { %v292_v6 = vadd.f32 1.0, %v347_v5 }
  0xbe   :  { %350 = vrcp.f32 %v292_v6  ;;  %v304_v12 = vand.u32 2147483648, %v292_v6  ;;  %v302_v15 = vand.u32 2147483647, %v292_v6  ;;  %vm298_vm2 = vweird.f32 %v292_v6 }
  0xc0   :  { %v305_v21 = vor.u32 1.1754944e-38, %v304_v12  ;;  %vm303_vm4 = vcmp.eq.f32.partialorder %v302_v15, 8.507059e+37 }
  0xc1   :  { %v349_v7 = vpop.eup %348 }
  0xc2   :  { %v272_v8 = vadd.f32 1.0, %v349_v7 }
  0xc4   :  { %v351_v9 = vpop.eup %350  ;;  %352 = vrcp.f32 %v272_v8  ;;  %v284_v30 = vand.u32 2147483648, %v272_v8  ;;  %vm278_vm6 = vweird.f32 %v272_v8  ;;  %v282_v31 = vand.u32 2147483647, %v272_v8 }
  0xc5   :  { %v294_v10 = vmul.f32 %v351_v9, %v292_v6  ;;  %vm299_vm1 = vweird.f32 %v351_v9 }
  0xc6   :  { %vm300_vm3 = vmor %vm298_vm2, %vm299_vm1  ;;  %v285_v34 = vor.u32 1.1754944e-38, %v284_v30  ;;  %vm283_vm8 = vcmp.eq.f32.partialorder %v282_v31, 8.507059e+37 }
  0xc7   :  { %v295_v11 = vsub.f32 1.0, %v294_v10 }
  0xc9   :  { %v296_v14 = vmul.f32 %v351_v9, %v295_v11 }
  0xca   :  { %v353_v16 = vpop.eup %352 }
  0xcb   :  { %v274_v18 = vmul.f32 %v353_v16, %v272_v8  ;;  %v297_v19 = vadd.f32 %v351_v9, %v296_v14  ;;  %vm279_vm5 = vweird.f32 %v353_v16 }
  0xcc   :  { %vm280_vm7 = vmor %vm278_vm6, %vm279_vm5 }
  0xcd   :  { %v275_v22 = vsub.f32 1.0, %v274_v18  ;;  %v301_v24 = vsel %vm300_vm3, %v351_v9, %v297_v19 }
  0xce   :  { %v306_v25 = vsel %vm303_vm4, %v305_v21, %v301_v24 }
  0xcf   :  { %v308_v26 = vmul.f32 %v306_v25, %v265_v20  ;;  %v276_v27 = vmul.f32 %v353_v16, %v275_v22 }
  0xd1   :  { %v309_v28 = vadd.f32 %v308_v26, %v158_v23  ;;  %v277_v29 = vadd.f32 %v353_v16, %v276_v27 }
  0xd3   :  { %354 = vtanh.f32 %v309_v28  ;;  %v281_v32 = vsel %vm280_vm7, %v353_v16, %v277_v29 }
  0xd4   :  { %v286_v36 = vsel %vm283_vm8, %v285_v34, %v281_v32 }
  0xd9   :  { %v355_v33 = vpop.eup %354 }
  0xda   :  { %v311_v35 = vsub.f32 %v541_v48, %v355_v33 }
  0xdc   :  { %v312_v37 = vmul.f32 %v311_v35, %v286_v36 }
  0xde   :  { %v313_v38 = vadd.f32 %v355_v33, %v312_v37 }
  0xe0   :  { %314 = vst [vmem:[#allocation10] sm:$0xff] %v313_v38 }
  0xe1   :  { %325 = dma.vmem_to_hbm [thread:$0]  %s321_s13, 128, %s323_s16, [#allocation4]  }
  0xe2   :  { %482 = dma.done.wait [#allocation4], 128  }
  0xe3   :  { %483 = vsyncadd [#allocation4], 4294967168 }
  0xe4   :  { %330 = vsyncpa [#allocation3], 1 }
  0xe5   :  { %331 = vsyncpa [#allocation6], 1 }
  0xe6   :  { %332 = vsyncpa [#allocation9], 1 }
  0xe7   :  { %333 = vsyncpa [#allocation4], 1 }

</bundles_post_ra>
